<compile_context>
chip_gen: v6e
topology: v6e:2x2x1
jax: 0.10.0
libtpu: 0.0.40
codegen_flags: <defaults>
</compile_context>

<pallas_src>
import functools

import jax
import jax.numpy as jnp
from jax import lax
from jax.experimental import pallas as pl
from jax.experimental.pallas import tpu as pltpu


# ---------------------------------------------------------------------------
# Kernel
# ---------------------------------------------------------------------------
def gem_kernel(p_ref, x_ref, o_ref, acc_ref, *, eps, inv_n, rows_chunk,
               lane_dense):
    """One (row-block, spatial-block) tile per grid step.

    p_ref   : (1,)            learnable exponent p in SMEM (scalar prefetch)
    x_ref   : (TR, TS)        tile of the flattened (B*C, H*W) input
    o_ref   : (TR, 1)         pooled output (written on the last spatial step)
    acc_ref : (TR, 128|1) f32 running lane-partial sums of clamp(x, eps)^p
    """
    TR, TS = x_ref.shape
    n_row_chunks = TR // rows_chunk
    j = pl.program_id(1)

    @pl.when(j == 0)
    def _init():
        acc_ref[...] = jnp.zeros_like(acc_ref)

    p = p_ref[0]

    def process_rows(r0, pow_fn):
        x = x_ref[pl.ds(r0, rows_chunk), :].astype(jnp.float32)
        xc = jnp.maximum(x, eps)                     # clamp(min=eps) > 0
        xp = pow_fn(xc)                              # (rows_chunk, TS)
        if lane_dense:
            # Fold TS -> 128 lanes with vreg-aligned VPU adds (no XLU, no
            # masked stores in the hot loop).
            part = xp[:, 0:128]
            for kk in range(1, TS // 128):
                part = part + xp[:, kk * 128:(kk + 1) * 128]
        else:
            part = jnp.sum(xp, axis=-1, keepdims=True)
        acc_ref[pl.ds(r0, rows_chunk), :] += part

    def accumulate(pow_fn):
        if n_row_chunks == 1:
            process_rows(0, pow_fn)
        else:
            def row_body(ri, carry):
                r0 = pl.multiple_of(ri * rows_chunk, rows_chunk)
                process_rows(r0, pow_fn)
                return carry
            lax.fori_loop(0, n_row_chunks, row_body, 0)

    use_cube = p == 3.0

    @pl.when(use_cube)
    def _fast_p3():                                  # VPU-only fast path
        accumulate(lambda v: v * v * v)

    @pl.when(jnp.logical_not(use_cube))
    def _general_p():                                # EUP exp/log path
        accumulate(lambda v: jnp.exp(p * jnp.log(v)))

    @pl.when(j == pl.num_programs(1) - 1)
    def _finalize():
        if lane_dense:
            total = jnp.sum(acc_ref[...], axis=-1, keepdims=True)  # one XLU reduce
        else:
            total = acc_ref[...]
        mean = total * inv_n                          # avg_pool over full H*W
        o_ref[...] = jnp.exp(jnp.log(mean) / p).astype(o_ref.dtype)  # mean^(1/p)


# ---------------------------------------------------------------------------
# Wrapper
# ---------------------------------------------------------------------------
def _largest_divisor(total, unit, cap):
    """Largest divisor of `total` that is a multiple of `unit` and <= cap.

    Returns None if no such divisor exists (caller falls back to full extent,
    which is always a legal block size).
    """
    best = None
    d = unit
    limit = min(total, cap)
    while d <= limit:
        if total % d == 0:
            best = d
        d += unit
    return best


def gem_pallas(x, p, *, eps=1e-6,
               target_block_bytes=6 * 1024 * 1024,
               max_spatial_tile=2048,
               chunk_bytes=2 * 1024 * 1024):
    """x: (B, C, H, W) float. p: shape-(1,) learnable exponent.

    Returns (B, C, 1, 1), matching F.avg_pool2d(x.clamp(eps)^p, (H, W))^(1/p).
    """
    B, C, H, W = x.shape
    BC, S = B * C, H * W
    x2 = x.reshape(BC, S)

    in_itemsize = jnp.dtype(x2.dtype).itemsize
    unit = {4: 8, 2: 16, 1: 32}.get(in_itemsize, 8)   # dtype-aware sublane unit

    # ---- spatial (lane) tile ------------------------------------------------
    if S % 128 == 0 and S > max_spatial_tile:
        TS = _largest_divisor(S, 128, max_spatial_tile) or S
    else:
        TS = S                                        # full extent (always legal)
    lane_dense = (TS % 128 == 0)

    # ---- row (sublane) tile: target ~target_block_bytes of input per step ---
    target_rows = max(unit, target_block_bytes // max(1, TS * in_itemsize))
    TR = _largest_divisor(BC, unit, min(BC, target_rows))
    if TR is None:
        TR = BC                                       # full extent fallback
    # Guarantee >= 2 blocks on the parallel axis when possible (v7x megacore).
    if BC // TR < 2:
        alt = _largest_divisor(BC, unit, max(unit, BC // 2))
        if alt is not None:
            TR = alt

    # ---- in-kernel row chunk: bound f32 temp live ranges to ~chunk_bytes ----
    max_chunk_rows = max(unit, chunk_bytes // max(1, TS * 4))
    rows_chunk = _largest_divisor(TR, unit, min(TR, max_chunk_rows)) or TR

    grid = (BC // TR, S // TS)
    acc_lanes = 128 if lane_dense else 1

    # ---- VMEM budget (double-buffered input + chunk temps + accumulator) ----
    block_in_bytes = TR * TS * in_itemsize
    chunk_f32_bytes = rows_chunk * TS * 4
    acc_bytes = TR * acc_lanes * 4
    need = 2 * block_in_bytes + 4 * chunk_f32_bytes + acc_bytes + (1 << 20)
    vmem_limit = int(min(max(2 * need, 32 * 1024 * 1024), 60 * 1024 * 1024))

    kernel = functools.partial(
        gem_kernel,
        eps=float(eps),
        inv_n=1.0 / float(S),
        rows_chunk=rows_chunk,
        lane_dense=lane_dense,
    )

    out = pl.pallas_call(
        kernel,
        out_shape=jax.ShapeDtypeStruct((BC, 1), x.dtype),
        grid_spec=pltpu.PrefetchScalarGridSpec(
            num_scalar_prefetch=1,
            grid=grid,
            in_specs=[pl.BlockSpec((TR, TS), lambda i, j, p_sref: (i, j))],
            out_specs=pl.BlockSpec((TR, 1), lambda i, j, p_sref: (i, 0)),
            scratch_shapes=[pltpu.VMEM((TR, acc_lanes), jnp.float32)],
        ),
        compiler_params=pltpu.CompilerParams(
            dimension_semantics=("parallel", "arbitrary"),
            vmem_limit_bytes=vmem_limit,
        ),
    )(p.reshape(1).astype(jnp.float32), x2)

    return out.reshape(B, C, 1, 1)


# ---------------------------------------------------------------------------
# Pure-JAX reference (mirrors the PyTorch GeM.forward exactly)
# ---------------------------------------------------------------------------
def gem_ref(x, p, eps):
    xc = jnp.maximum(x, eps)                               # x.clamp(min=eps)
    m = jnp.mean(xc ** p, axis=(-2, -1), keepdims=True)    # avg_pool2d over (H, W)
    return m ** (1.0 / p)                                  # .pow(1/p)


if __name__ == "__main__":
    B, C, H, W = 2, 4, 16, 16
    eps = 1e-6

    key = jax.random.PRNGKey(0)
    x = jax.random.normal(key, (B, C, H, W), jnp.float32)
    p3 = jnp.ones((1,), jnp.float32) * 3.0                 # nn.Parameter(ones(1)*3)

    # 1) Default tiling, p == 3 -> VPU cube fast path, single spatial step.
    out = gem_pallas(x, p3, eps=eps)
    jax.block_until_ready(out)
    ref = gem_ref(x, p3, eps)
    assert out.shape == (B, C, 1, 1)
    assert jnp.allclose(out, ref, atol=1e-5, rtol=1e-5), (
        float(jnp.max(jnp.abs(out - ref))))

    # 2) Forced spatial tiling -> exercises cross-step accumulator init/finalize.
    out2 = gem_pallas(x, p3, eps=eps, max_spatial_tile=128)
    jax.block_until_ready(out2)
    assert jnp.allclose(out2, ref, atol=1e-5, rtol=1e-5), (
        float(jnp.max(jnp.abs(out2 - ref))))

    # 3) Non-integer p -> general exp(p*log(x)) path.
    p25 = jnp.ones((1,), jnp.float32) * 2.5
    out3 = gem_pallas(x, p25, eps=eps)
    jax.block_until_ready(out3)
    ref3 = gem_ref(x, p25, eps)
    assert jnp.allclose(out3, ref3, atol=1e-5, rtol=1e-5), (
        float(jnp.max(jnp.abs(out3 - ref3))))

    # 4) Realistic GeM feature map (H*W = 49, not a multiple of 128) ->
    #    full-extent spatial block / non-lane-dense accumulator path.
    x4 = jax.random.normal(jax.random.PRNGKey(0), (B, C, 7, 7), jnp.float32)
    out4 = gem_pallas(x4, p3, eps=eps)
    jax.block_until_ready(out4)
    ref4 = gem_ref(x4, p3, eps)
    assert jnp.allclose(out4, ref4, atol=1e-5, rtol=1e-5), (
        float(jnp.max(jnp.abs(out4 - ref4))))

    print("KERNEL_OK")
</pallas_src>

<mosaic_0001>
module attributes {stable_mosaic.version = 11 : i64} {
  func.func @gem_kernel(%arg0: i32, %arg1: i32, %arg2: memref<1xf32, #tpu.memory_space<smem>>, %arg3: memref<8x256xf32, #tpu.memory_space<vmem>>, %arg4: memref<8x1xf32, #tpu.memory_space<vmem>>, %arg5: memref<8x128xf32, #tpu.memory_space<vmem>>) attributes {dimension_semantics = [#tpu.dimension_semantics<parallel>, #tpu.dimension_semantics<arbitrary>], iteration_bounds = array<i64: 1, 1>, scalar_prefetch = 1 : i64, scratch_operands = 1 : i64, tpu.core_type = #tpu.core_type<tc>, window_params = [{transform_indices = @transform_0, window_bounds = array<i64: 8, 256>}, {transform_indices = @transform_1, window_bounds = array<i64: 8, 1>}]} {
    %c0_i32 = arith.constant 0 : i32
    %0 = arith.cmpi eq, %arg1, %c0_i32 : i32
    %1 = arith.extui %0 : i1 to i32
    %c0_i32_0 = arith.constant 0 : i32
    %2 = arith.cmpi ne, %1, %c0_i32_0 : i32
    scf.if %2 {
      %cst_5 = arith.constant 0.000000e+00 : f32
      %13 = vector.broadcast %cst_5 : f32 to vector<8x128xf32>
      %c0_6 = arith.constant 0 : index
      %c0_7 = arith.constant 0 : index
      %14 = vector.load %arg5[%c0_6, %c0_7] : memref<8x128xf32, #tpu.memory_space<vmem>>, vector<8x128xf32>
      tpu.vector_store %arg5[%c0_6, %c0_7], %13 {strides = array<i32>} : memref<8x128xf32, #tpu.memory_space<vmem>>, vector<8x128xf32>,
    } else {
    }
    %c0 = arith.constant 0 : index
    %3 = memref.load %arg2[%c0] : memref<1xf32, #tpu.memory_space<smem>>
    %cst = arith.constant 3.000000e+00 : f32
    %4 = arith.cmpf oeq, %3, %cst : f32
    %5 = arith.extui %4 : i1 to i32
    %c0_i32_1 = arith.constant 0 : i32
    %6 = arith.cmpi ne, %5, %c0_i32_1 : i32
    scf.if %6 {
      %c0_5 = arith.constant 0 : index
      %c0_6 = arith.constant 0 : index
      %13 = vector.load %arg3[%c0_5, %c0_6] : memref<8x256xf32, #tpu.memory_space<vmem>>, vector<8x256xf32>
      %cst_7 = arith.constant 9.99999997E-7 : f32
      %14 = vector.broadcast %cst_7 : f32 to vector<8x256xf32>
      %15 = arith.maximumf %13, %14 : vector<8x256xf32>
      %16 = arith.mulf %15, %15 : vector<8x256xf32>
      %17 = arith.mulf %16, %15 : vector<8x256xf32>
      %18 = vector.extract_strided_slice %17 {offsets = [0, 0], sizes = [8, 128], strides = [1, 1]} : vector<8x256xf32> to vector<8x128xf32>
      %19 = vector.extract_strided_slice %17 {offsets = [0, 128], sizes = [8, 128], strides = [1, 1]} : vector<8x256xf32> to vector<8x128xf32>
      %20 = arith.addf %18, %19 : vector<8x128xf32>
      %c0_8 = arith.constant 0 : index
      %c0_9 = arith.constant 0 : index
      %21 = vector.load %arg5[%c0_8, %c0_9] : memref<8x128xf32, #tpu.memory_space<vmem>>, vector<8x128xf32>
      %22 = arith.addf %21, %20 : vector<8x128xf32>
      %c0_10 = arith.constant 0 : index
      %c0_11 = arith.constant 0 : index
      %23 = vector.load %arg5[%c0_10, %c0_11] : memref<8x128xf32, #tpu.memory_space<vmem>>, vector<8x128xf32>
      tpu.vector_store %arg5[%c0_10, %c0_11], %22 {strides = array<i32>} : memref<8x128xf32, #tpu.memory_space<vmem>>, vector<8x128xf32>,
    } else {
    }
    %true = arith.constant true
    %7 = arith.xori %4, %true : i1
    %8 = arith.extui %7 : i1 to i32
    %c0_i32_2 = arith.constant 0 : i32
    %9 = arith.cmpi ne, %8, %c0_i32_2 : i32
    scf.if %9 {
      %c0_5 = arith.constant 0 : index
      %c0_6 = arith.constant 0 : index
      %13 = vector.load %arg3[%c0_5, %c0_6] : memref<8x256xf32, #tpu.memory_space<vmem>>, vector<8x256xf32>
      %cst_7 = arith.constant 9.99999997E-7 : f32
      %14 = vector.broadcast %cst_7 : f32 to vector<8x256xf32>
      %15 = arith.maximumf %13, %14 : vector<8x256xf32>
      %16 = math.log %15 : vector<8x256xf32>
      %17 = vector.broadcast %3 : f32 to vector<8x256xf32>
      %18 = arith.mulf %17, %16 : vector<8x256xf32>
      %19 = math.exp %18 : vector<8x256xf32>
      %20 = vector.extract_strided_slice %19 {offsets = [0, 0], sizes = [8, 128], strides = [1, 1]} : vector<8x256xf32> to vector<8x128xf32>
      %21 = vector.extract_strided_slice %19 {offsets = [0, 128], sizes = [8, 128], strides = [1, 1]} : vector<8x256xf32> to vector<8x128xf32>
      %22 = arith.addf %20, %21 : vector<8x128xf32>
      %c0_8 = arith.constant 0 : index
      %c0_9 = arith.constant 0 : index
      %23 = vector.load %arg5[%c0_8, %c0_9] : memref<8x128xf32, #tpu.memory_space<vmem>>, vector<8x128xf32>
      %24 = arith.addf %23, %22 : vector<8x128xf32>
      %c0_10 = arith.constant 0 : index
      %c0_11 = arith.constant 0 : index
      %25 = vector.load %arg5[%c0_10, %c0_11] : memref<8x128xf32, #tpu.memory_space<vmem>>, vector<8x128xf32>
      tpu.vector_store %arg5[%c0_10, %c0_11], %24 {strides = array<i32>} : memref<8x128xf32, #tpu.memory_space<vmem>>, vector<8x128xf32>,
    } else {
    }
    %c0_i32_3 = arith.constant 0 : i32
    %10 = arith.cmpi eq, %arg1, %c0_i32_3 : i32
    %11 = arith.extui %10 : i1 to i32
    %c0_i32_4 = arith.constant 0 : i32
    %12 = arith.cmpi ne, %11, %c0_i32_4 : i32
    scf.if %12 {
      %c0_5 = arith.constant 0 : index
      %c0_6 = arith.constant 0 : index
      %13 = vector.load %arg5[%c0_5, %c0_6] : memref<8x128xf32, #tpu.memory_space<vmem>>, vector<8x128xf32>
      %cst_7 = arith.constant dense<0.000000e+00> : vector<8xf32>
      %14 = vector.multi_reduction <add>, %13, %cst_7 [1] : vector<8x128xf32> to vector<8xf32>
      %15 = vector.shape_cast %14 : vector<8xf32> to vector<8x1xf32>
      %cst_8 = arith.constant 3.906250e-03 : f32
      %16 = vector.broadcast %cst_8 : f32 to vector<8x1xf32>
      %17 = arith.mulf %15, %16 : vector<8x1xf32>
      %18 = math.log %17 : vector<8x1xf32>
      %19 = vector.broadcast %3 : f32 to vector<8x1xf32>
      %20 = arith.divf %18, %19 : vector<8x1xf32>
      %21 = math.exp %20 : vector<8x1xf32>
      %c0_9 = arith.constant 0 : index
      %c0_10 = arith.constant 0 : index
      %22 = vector.load %arg4[%c0_9, %c0_10] : memref<8x1xf32, #tpu.memory_space<vmem>>, vector<8x1xf32>
      tpu.vector_store %arg4[%c0_9, %c0_10], %21 {strides = array<i32>} : memref<8x1xf32, #tpu.memory_space<vmem>>, vector<8x1xf32>,
    } else {
    }
    return
  }
  func.func @transform_0(%arg0: i32, %arg1: i32, %arg2: memref<1xf32, #tpu.memory_space<smem>>) -> (i32, i32) {
    %c0_i32 = arith.constant 0 : i32
    return %arg0, %arg1 : i32, i32
  }
  func.func @transform_1(%arg0: i32, %arg1: i32, %arg2: memref<1xf32, #tpu.memory_space<smem>>) -> (i32, i32) {
    %c0_i32 = arith.constant 0 : i32
    %c0_i32_0 = arith.constant 0 : i32
    return %arg0, %c0_i32 : i32, i32
  }
}

</mosaic_0001>

<bundles_post_ra>
// kernel: tpu_custom_call.1
= control target key start
LH: loop header
LB: loop body
LE: loop exit
PB: predicated region body
PF: predicated region fallthrough
CT: control target
= control target key end

     0   :  { %8 = vsyncpa [#allocation6], 0  ;;  %s125_s9 = smov [#allocation5]   ;;  %s165_s0 = inlined_call_operand.<no memory space> [shape: f32[1], index: 0, kind: input, shape index: {}]   ;;  %s166_s1 = inlined_call_operand.hbm [shape: f32[8,256], index: 1, kind: input, shape index: {}]   ;;  %s167_s2 = inlined_call_operand.vmem [shape: f32[8,1], index: 2, kind: output, shape index: {}]  }
   0x1   :  { %s15_s10 = sshll.u32 %s125_s9, 4  ;;  %s16_s10 = int_to_ptr.vmem [resolvable:$true] %s15_s10 }
   0x2   :  { %s111_s11 = scalar_lea.vmem %s16_s10, 256  ;;  %p116_p1 = scmp.lt.s32.totalorder %s16_s10, %s16_s10 }
   0x3   :  { %p112_p0 = scmp.ne.s32.totalorder %s16_s10, %s111_s11  ;;  %p117_p2 = scmp.lt.s32.totalorder %s111_s11, %s111_s11 }
   0x5   :  { %p118_p3 = por %p117_p2, %p116_p1 }
   0x7   :  { %p119_p4 = pnand %p118_p3, %p112_p0 }
   0x9   :  { %122 = shalt.err (!%p119_p4)
}
   0xa   :  { %18 = dma.hbm_to_vmem [thread:$0]  %s166_s1, 256, %s16_s10, [#allocation6]  }
   0xb   :  { %123 = dma.done.wait [#allocation6], 256  }
   0xc   :  { %124 = vsyncadd [#allocation6], 4294967040  ;;  %p28_p5 = scmp.eq.f32.partialorder %s165_s0, 3.0  ;;  %v126_v0 = vmov 0.0  }
   0xd   :  { %26 = vst [vmem:[#allocation2] sm:$0xff] %v126_v0  ;;  %v32_v1 = vld [vmem:[#allocation5] sm:$0xff] (%p28_p5)  ;;  %v33_v2 = vld [vmem:[#allocation5 + $0x8] sm:$0xff] (%p28_p5) }
   0xe   :  { %31 = sbr.rel (!%p28_p5) target bundleno = 25 (0x19), region = 17  ;;  %v34_v3 = vmax.f32 (%p28_p5), %v32_v1, 1e-06  ;;  %v35_v4 = vmax.f32 (%p28_p5), %v33_v2, 1e-06 }
  0x10   :  { %v36_v5 = vmul.f32 (%p28_p5), %v34_v3, %v34_v3  ;;  %v37_v6 = vmul.f32 (%p28_p5), %v35_v4, %v35_v4 }
  0x12   :  { %v38_v7 = vmul.f32 (%p28_p5), %v36_v5, %v34_v3  ;;  %v39_v8 = vmul.f32 (%p28_p5), %v37_v6, %v35_v4 }
  0x14   :  { %v41_v9 = vld [vmem:[#allocation2] sm:$0xff]  ;;  %v40_v10 = vadd.f32 %v39_v8, %v38_v7 }
  0x16   :  { %v42_v11 = vadd.f32 %v41_v9, %v40_v10 }
  0x18   :  { %43 = vst [vmem:[#allocation2] sm:$0xff] %v42_v11 }
  0x19 PF:  { %46 = sbr.rel (%p28_p5) target bundleno = 73 (0x49), region = 21 }
  0x1e   :  { %v47_v12 = vld [vmem:[#allocation5] sm:$0xff]  ;;  %v48_v13 = vld [vmem:[#allocation5 + $0x8] sm:$0xff]  ;;  %v55_v17 = vstv %s165_s0 }
  0x1f   :  { %v49_v14 = vmax.f32 %v47_v12, 1e-06  ;;  %v50_v15 = vmax.f32 %v48_v13, 1e-06  ;;  %v63_v27 = vld [vmem:[#allocation2] sm:$0xff] }
  0x21   :  { %89 = vlog2.f32 %v49_v14 }
  0x22   :  { %91 = vlog2.f32 %v50_v15 }
  0x2e   :  { %v90_v16 = vpop.eup %89 }
  0x2f   :  { %v92_v18 = vpop.eup %91  ;;  %v52_v19 = vmul.f32 0.6931472, %v90_v16 }
  0x30   :  { %v54_v20 = vmul.f32 0.6931472, %v92_v18 }
  0x31   :  { %v56_v21 = vmul.f32 %v55_v17, %v52_v19 }
  0x32   :  { %v57_v22 = vmul.f32 %v55_v17, %v54_v20 }
  0x33   :  { %v58_v23 = vmul.f32 1.442695, %v56_v21 }
  0x34   :  { %v60_v24 = vmul.f32 1.442695, %v57_v22 }
  0x35   :  { %93 = vpow2.f32 %v58_v23 }
  0x36   :  { %95 = vpow2.f32 %v60_v24 }
  0x42   :  { %v94_v25 = vpop.eup %93 }
  0x43   :  { %v96_v26 = vpop.eup %95 }
  0x44   :  { %v62_v28 = vadd.f32 %v96_v26, %v94_v25 }
  0x46   :  { %v64_v29 = vadd.f32 %v63_v27, %v62_v28 }
  0x48   :  { %65 = vst [vmem:[#allocation2] sm:$0xff] %v64_v29 }
  0x49 PF:  { %v75_v31 = vstv %s165_s0  ;;  %vm80_vm0 = vcmask 7168  }
  0x4a   :  { %97 = vrcp.f32 %v75_v31 }
  0x4f   :  { %v69_v30 = vld [vmem:[#allocation2] sm:$0xff] }
  0x50   :  { %70 = vadd.xlane.f32.xlu0 %v69_v30 }
  0x57   :  { %v98_v34 = vpop.eup %97 }
  0xd9   :  { %v71_v32 = vpop.xlane.xlu0 %70 }
  0xda   :  { %v72_v33 = vmul.f32 0.00390625, %v71_v32 }
  0xdc   :  { %99 = vlog2.f32 %v72_v33 }
  0xe9   :  { %v100_v35 = vpop.eup %99 }
  0xea   :  { %v74_v36 = vmul.f32 0.6931472, %v100_v35 }
  0xec   :  { %v77_v37 = vmul.f32 %v98_v34, %v74_v36 }
  0xee   :  { %v78_v38 = vmul.f32 1.442695, %v77_v37 }
  0xf0   :  { %101 = vpow2.f32 %v78_v38 }
  0xfd   :  { %v102_v39 = vpop.eup %101 }
  0xfe   :  { %81 = vst.msk [vmem:[%s167_s2] sm:$0xff] %vm80_vm0, %v102_v39 }
  0xff   :  { %86 = vsyncpa [#allocation6], 1 }

</bundles_post_ra>
